<compile_context>
chip_gen: v5e
topology: v5e:2x2
jax: 0.10.0
libtpu: 0.0.40
codegen_flags: <defaults>
</compile_context>

<pallas_src>
import functools

import jax
import jax.numpy as jnp
from jax import lax
from jax.experimental import pallas as pl
from jax.experimental.pallas import tpu as pltpu  # noqa: F401  (kept for TPU-specific extensions)


def _fused_mlp_kernel(*refs, n_layers: int):
    """Fused MLP forward. refs = (x, w_0, b_0, ..., w_{L-1}, b_{L-1}, out)."""
    x_ref = refs[0]
    o_ref = refs[-1]

    x = x_ref[...]
    for i in range(n_layers):
        w_ref = refs[1 + 2 * i]   # (N_i, K_i)  — PyTorch nn.Linear layout
        b_ref = refs[2 + 2 * i]   # (1, N_i)
        # x[M, K] contracted with w[N, K] on K  ==  x @ w.T, done natively on
        # the MXU (trans-B); f32 accumulation regardless of input dtype.
        acc = lax.dot_general(
            x,
            w_ref[...],
            dimension_numbers=(((1,), (1,)), ((), ())),
            preferred_element_type=jnp.float32,
        )
        acc = acc + b_ref[...]              # (1, N) broadcasts over rows
        if i < n_layers - 1:
            acc = jnp.maximum(acc, 0.0)     # ReLU on all but the last layer
        x = acc
    o_ref[...] = x.astype(o_ref.dtype)


def mlp_target_forward(x, weights):
    """Pallas equivalent of MLPTarget.forward(x, weights) — one kernel launch.

    x: (M, K0) float32
    weights: dict with 'fc_{i}_weights' of shape (N_i, K_i) and 'fc_{i}_bias'
             of shape (N_i,), exactly as the PyTorch module expects.
    """
    n_layers = len(weights) // 2
    ws = [weights[f"fc_{i}_weights"] for i in range(n_layers)]
    bs = [weights[f"fc_{i}_bias"].reshape(1, -1) for i in range(n_layers)]

    M = x.shape[0]
    N_out = ws[-1].shape[0]

    # All operands as single full-array VMEM blocks (block_shape == array shape
    # is always legal; no (8,128) padding constraint triggered). No grid: the
    # whole MLP fits comfortably in VMEM at these shapes.
    operands = [x]
    in_specs = [pl.BlockSpec(x.shape, lambda: (0, 0))]
    for w, b in zip(ws, bs):
        operands.append(w)
        in_specs.append(pl.BlockSpec(w.shape, lambda: (0, 0)))
        operands.append(b)
        in_specs.append(pl.BlockSpec(b.shape, lambda: (0, 0)))

    kernel = functools.partial(_fused_mlp_kernel, n_layers=n_layers)
    return pl.pallas_call(
        kernel,
        out_shape=jax.ShapeDtypeStruct((M, N_out), x.dtype),
        in_specs=in_specs,
        out_specs=pl.BlockSpec((M, N_out), lambda: (0, 0)),
    )(*operands)


def _reference_forward(x, weights):
    n_layers = len(weights) // 2
    for i in range(n_layers):
        x = x @ weights[f"fc_{i}_weights"].T + weights[f"fc_{i}_bias"]
        if i < n_layers - 1:
            x = jnp.maximum(x, 0.0)
    return x


if __name__ == "__main__":
    key = jax.random.PRNGKey(0)

    # Small MLP: 16 -> 32 -> 32 -> 10, batch=2 (same toy shapes as the module implies).
    batch = 2
    dims = [16, 32, 32, 10]

    k_x, key = jax.random.split(key)
    x = jax.random.normal(k_x, (batch, dims[0]), dtype=jnp.float32)

    weights = {}
    for i in range(len(dims) - 1):
        kw, kb, key = jax.random.split(key, 3)
        weights[f"fc_{i}_weights"] = (
            jax.random.normal(kw, (dims[i + 1], dims[i]), dtype=jnp.float32) * 0.1
        )
        weights[f"fc_{i}_bias"] = (
            jax.random.normal(kb, (dims[i + 1],), dtype=jnp.float32) * 0.1
        )

    out = mlp_target_forward(x, weights)
    out = jax.block_until_ready(out)

    ref = _reference_forward(x, weights)
    assert out.shape == (batch, dims[-1])
    assert jnp.allclose(out, ref, atol=1e-5, rtol=1e-5)

    print("KERNEL_OK")
</pallas_src>

<mosaic_0001>
module attributes {stable_mosaic.version = 11 : i64} {
  func.func @_fused_mlp_kernel(%arg0: memref<2x16xf32, #tpu.memory_space<vmem>>, %arg1: memref<32x16xf32, #tpu.memory_space<vmem>>, %arg2: memref<1x32xf32, #tpu.memory_space<vmem>>, %arg3: memref<32x32xf32, #tpu.memory_space<vmem>>, %arg4: memref<1x32xf32, #tpu.memory_space<vmem>>, %arg5: memref<10x32xf32, #tpu.memory_space<vmem>>, %arg6: memref<1x10xf32, #tpu.memory_space<vmem>>, %arg7: memref<2x10xf32, #tpu.memory_space<vmem>>) attributes {dimension_semantics = [], scalar_prefetch = 0 : i64, scratch_operands = 0 : i64, tpu.core_type = #tpu.core_type<tc>} {
    %c0 = arith.constant 0 : index
    %c0_0 = arith.constant 0 : index
    %0 = vector.load %arg0[%c0, %c0_0] : memref<2x16xf32, #tpu.memory_space<vmem>>, vector<2x16xf32>
    %c0_1 = arith.constant 0 : index
    %c0_2 = arith.constant 0 : index
    %1 = vector.load %arg1[%c0_1, %c0_2] : memref<32x16xf32, #tpu.memory_space<vmem>>, vector<32x16xf32>
    %cst = arith.constant dense<0.000000e+00> : vector<2x32xf32>
    %2 = tpu.matmul %0, %1, %cst {dimension_numbers = #tpu.dot_dimension_numbers<[1], [1], [0], [0], [0, 0, 1, 0], [], []>} : vector<2x16xf32>, vector<32x16xf32>, vector<2x32xf32> -> vector<2x32xf32>
    %c0_3 = arith.constant 0 : index
    %c0_4 = arith.constant 0 : index
    %3 = vector.load %arg2[%c0_3, %c0_4] : memref<1x32xf32, #tpu.memory_space<vmem>>, vector<1x32xf32>
    %4 = vector.broadcast %3 : vector<1x32xf32> to vector<2x32xf32>
    %5 = arith.addf %2, %4 : vector<2x32xf32>
    %cst_5 = arith.constant 0.000000e+00 : f32
    %6 = vector.broadcast %cst_5 : f32 to vector<2x32xf32>
    %7 = arith.maximumf %5, %6 : vector<2x32xf32>
    %c0_6 = arith.constant 0 : index
    %c0_7 = arith.constant 0 : index
    %8 = vector.load %arg3[%c0_6, %c0_7] : memref<32x32xf32, #tpu.memory_space<vmem>>, vector<32x32xf32>
    %cst_8 = arith.constant dense<0.000000e+00> : vector<2x32xf32>
    %9 = tpu.matmul %7, %8, %cst_8 {dimension_numbers = #tpu.dot_dimension_numbers<[1], [1], [0], [0], [0, 0, 1, 0], [], []>} : vector<2x32xf32>, vector<32x32xf32>, vector<2x32xf32> -> vector<2x32xf32>
    %c0_9 = arith.constant 0 : index
    %c0_10 = arith.constant 0 : index
    %10 = vector.load %arg4[%c0_9, %c0_10] : memref<1x32xf32, #tpu.memory_space<vmem>>, vector<1x32xf32>
    %11 = vector.broadcast %10 : vector<1x32xf32> to vector<2x32xf32>
    %12 = arith.addf %9, %11 : vector<2x32xf32>
    %cst_11 = arith.constant 0.000000e+00 : f32
    %13 = vector.broadcast %cst_11 : f32 to vector<2x32xf32>
    %14 = arith.maximumf %12, %13 : vector<2x32xf32>
    %c0_12 = arith.constant 0 : index
    %c0_13 = arith.constant 0 : index
    %15 = vector.load %arg5[%c0_12, %c0_13] : memref<10x32xf32, #tpu.memory_space<vmem>>, vector<10x32xf32>
    %cst_14 = arith.constant dense<0.000000e+00> : vector<2x10xf32>
    %16 = tpu.matmul %14, %15, %cst_14 {dimension_numbers = #tpu.dot_dimension_numbers<[1], [1], [0], [0], [0, 0, 1, 0], [], []>} : vector<2x32xf32>, vector<10x32xf32>, vector<2x10xf32> -> vector<2x10xf32>
    %c0_15 = arith.constant 0 : index
    %c0_16 = arith.constant 0 : index
    %17 = vector.load %arg6[%c0_15, %c0_16] : memref<1x10xf32, #tpu.memory_space<vmem>>, vector<1x10xf32>
    %18 = vector.broadcast %17 : vector<1x10xf32> to vector<2x10xf32>
    %19 = arith.addf %16, %18 : vector<2x10xf32>
    %c0_17 = arith.constant 0 : index
    %c0_18 = arith.constant 0 : index
    %20 = vector.load %arg7[%c0_17, %c0_18] : memref<2x10xf32, #tpu.memory_space<vmem>>, vector<2x10xf32>
    tpu.vector_store %arg7[%c0_17, %c0_18], %19 {strides = array<i32>} : memref<2x10xf32, #tpu.memory_space<vmem>>, vector<2x10xf32>,
    return
  }
}

</mosaic_0001>

<bundles_post_ra>
// kernel: tpu_custom_call.1
= control target key start
LH: loop header
LB: loop body
LE: loop exit
PB: predicated region body
PF: predicated region fallthrough
CT: control target
= control target key end

     0   :  { %12 = vsyncpa [#allocation3], 0  ;;  %s356_s0 = inlined_call_operand.vmem [shape: f32[2,16], index: 0, kind: input, shape index: {}]   ;;  %s357_s1 = inlined_call_operand.vmem [shape: f32[32,16], index: 1, kind: input, shape index: {}]   ;;  %s358_s2 = inlined_call_operand.hbm [shape: f32[1,32], index: 2, kind: input, shape index: {}]   ;;  %s359_s3 = inlined_call_operand.vmem [shape: f32[32,32], index: 3, kind: input, shape index: {}]   ;;  %s360_s4 = inlined_call_operand.vmem [shape: f32[1,32], index: 4, kind: input, shape index: {}]   ;;  %s361_s5 = inlined_call_operand.vmem [shape: f32[10,32], index: 5, kind: input, shape index: {}]   ;;  %s362_s6 = inlined_call_operand.vmem [shape: f32[1,10], index: 6, kind: input, shape index: {}]   ;;  %s363_s7 = inlined_call_operand.hbm [shape: f32[2,10], index: 7, kind: output, shape index: {}]  }
   0x1   :  { %13 = vsyncpa [#allocation4], 0  ;;  %s23_s26 = sshll.u32 %s358_s2, 4  ;;  %s256_s27 = smov [#allocation2]   ;;  %s24_s26 = int_to_ptr.hbm [resolvable:$true] %s23_s26 }
   0x2   :  { %s25_s28 = sshll.u32 %s256_s27, 4  ;;  %s26_s28 = int_to_ptr.vmem [resolvable:$true] %s25_s28 }
   0x3   :  { %28 = dma.hbm_to_vmem [thread:$0]  %s24_s26, 16, %s26_s28, [#allocation3]  }
   0x4   :  { %252 = dma.done.wait [#allocation3], 16  }
   0x5   :  { %253 = vsyncadd [#allocation3], 4294967280  ;;  %vm50_vm0 = vcmask 130048   ;;  %vm95_vm1 = vcmask 261120   ;;  %v45_v0 = vld [vmem:[%s357_s1 + $0x18] sm:$0xff]  ;;  %v44_v2 = vld [vmem:[%s357_s1 + $0x10] sm:$0xff] }
   0x6   :  { %186 = vmatpush.xpose.msk.msra.mxu0 %vm50_vm0, %v45_v0  ;;  %v90_v1 = vld [vmem:[%s359_s3 + $0x18] sm:$0xff]  ;;  %v89_v3 = vld [vmem:[%s359_s3 + $0x10] sm:$0xff]  ;;  %v43_v4 = vld [vmem:[%s357_s1 + $0x8] sm:$0xff]  ;;  %s257_s28 = smov [#allocation5]   ;;  %vm167_vm2 = vcmask 74752  }
   0x7   :  { %191 = vmatpush.xpose.msk.msra.mxu1 %vm95_vm1, %v90_v1  ;;  %v88_v5 = vld [vmem:[%s359_s3 + $0x8] sm:$0xff]  ;;  %v42_v6 = vld [vmem:[%s357_s1] sm:$0xff]  ;;  %s174_s29 = sshll.u32 %s257_s28, 4  ;;  %s175_s29 = int_to_ptr.vmem [resolvable:$true] %s174_s29 }
   0x8   :  { %v41_v7 = vld [vmem:[%s356_s0] sm:$0x3]  ;;  %v133_v9 = vld [vmem:[%s361_s5 + $0x8] sm:$0x3] }
   0x9   :  { %v87_v8 = vld [vmem:[%s359_s3] sm:$0xff]  ;;  %196 = vmatpush.xpose.msk.msra.mxu2 %vm95_vm1, %v133_v9 }
   0xa   :  { %187 = vmatpush.xpose.msk.msra.mxu0 %vm50_vm0, %v44_v2  ;;  %v201_v10 = vld [vmem:[#allocation2] ss:$0 sm:$0xff] }
   0xb   :  { %192 = vmatpush.xpose.msk.msra.mxu1 %vm95_vm1, %v89_v3  ;;  %v132_v14 = vld [vmem:[%s361_s5] sm:$0xff]  ;;  %s176_s5 = sshll.u32 %s363_s7, 4  ;;  %s177_s5 = int_to_ptr.hbm [resolvable:$true] %s176_s5 }
   0xc   :  { %v202_v15 = vld [vmem:[%s360_s4] ss:$0 sm:$0xff] }
   0xd   :  { %197 = vmatpush.xpose.msk.msra.mxu2 %vm95_vm1, %v132_v14  ;;  %v203_v19 = vld [vmem:[%s362_s6] ss:$0 sm:$0xff] }
   0xe   :  { %188 = vmatpush.xpose.msk.msra.mxu0 %vm50_vm0, %v43_v4 }
   0xf   :  { %193 = vmatpush.xpose.msk.msra.mxu1 %vm95_vm1, %v88_v5 }
  0x12   :  { %189 = vmatpush.xpose.msk.msra.mxu0 %vm50_vm0, %v42_v6 }
  0x13   :  { %194 = vmatpush.xpose.msk.msra.mxu1 %vm95_vm1, %v87_v8 }
  0x15   :  { %190 = vmatmul.msk.f32.vlgmr.msra.gmra.mxu0 %vm50_vm0, %v41_v7 }
  0x92   :  { %v83_v11 = vpop.f32.mrf.mxu0 }
  0x93   :  { %v84_v12 = vadd.f32 %v201_v10, %v83_v11 }
  0x95   :  { %v86_v13 = vmax.f32 %v84_v12, 0.0 }
  0x97   :  { %195 = vmatmul.msk.f32.vlgmr.msra.gmra.mxu1 %vm95_vm1, %v86_v13 }
 0x114   :  { %v128_v16 = vpop.f32.mrf.mxu1 }
 0x115   :  { %v129_v17 = vadd.f32 %v202_v15, %v128_v16 }
 0x117   :  { %v131_v18 = vmax.f32 %v129_v17, 0.0 }
 0x119   :  { %198 = vmatmul.msk.f32.vlgmr.msra.gmra.mxu2 %vm95_vm1, %v131_v18 }
 0x19c   :  { %v164_v20 = vpop.f32.mrf.mxu2 }
 0x19d   :  { %v165_v21 = vadd.f32 %v203_v19, %v164_v20 }
 0x19f   :  { %168 = vst.msk [vmem:[#allocation5] sm:$0x3] %vm167_vm2, %v165_v21 }
 0x1a0   :  { %179 = dma.vmem_to_hbm [thread:$0]  %s175_s29, 32, %s177_s5, [#allocation4]  }
 0x1a1   :  { %254 = dma.done.wait [#allocation4], 32  }
 0x1a2   :  { %255 = vsyncadd [#allocation4], 4294967264 }
 0x1a3   :  { %184 = vsyncpa [#allocation3], 1 }
 0x1a4   :  { %185 = vsyncpa [#allocation4], 1 }

</bundles_post_ra>
